<compile_context>
chip_gen: v6e
topology: v6e:2x2x1
jax: 0.10.0
libtpu: 0.0.40
codegen_flags: <defaults>
</compile_context>

<pallas_src>
import functools

import jax
import jax.numpy as jnp
from jax.experimental import pallas as pl
from jax.experimental.pallas import tpu as pltpu

_LANES = 128


def _mse_partial_kernel(x_ref, t_ref, out_ref, *, rows, tile_rows,
                        tiles_per_chunk, row_tiles, acc_rows,
                        need_row_mask, need_clamp):
    """Accumulate partial sums of (x - t)^2 for one chunk of row-tiles.

    x_ref, t_ref : VMEM tiles (tile_rows, 128), original dtype
    out_ref      : VMEM (acc_rows, 128) f32 per-chunk partial-sum block; its
                   block index depends only on the chunk axis, so it stays
                   VMEM-resident across the whole reduction (P3 pattern).
    """
    c = pl.program_id(0)   # chunk ("parallel" axis -- cores on v7x)
    k = pl.program_id(1)   # row-tile within chunk ("arbitrary" reduction axis)

    @pl.when(k == 0)
    def _init():
        out_ref[...] = jnp.zeros_like(out_ref)

    def _partial(masked):
        diff = x_ref[...].astype(jnp.float32) - t_ref[...].astype(jnp.float32)
        sq = diff * diff
        if masked:
            # Only the last real tile pays for the row-tail mask.
            gt = c * tiles_per_chunk + k
            row_ids = jax.lax.broadcasted_iota(jnp.int32, sq.shape, 0)
            global_row = gt * tile_rows + row_ids
            sq = jnp.where(global_row < rows, sq, 0.0)
        if sq.shape[0] == acc_rows:
            return sq
        # Fold (tile_rows, 128) -> (acc_rows, 128): acc_rows independent add
        # chains keep the VALU path throughput-bound (ILP), not latency-bound.
        return jnp.sum(sq.reshape(-1, acc_rows, sq.shape[-1]), axis=0)

    if not (need_row_mask or need_clamp):
        # Common case: every tile fully in bounds -- single unmasked path.
        out_ref[...] += _partial(False)
    else:
        gt = c * tiles_per_chunk + k
        full_limit = row_tiles - 1 if need_row_mask else row_tiles

        @pl.when(gt < full_limit)
        def _full():                       # unmasked fast path
            out_ref[...] += _partial(False)

        if need_row_mask:
            @pl.when(gt == row_tiles - 1)
            def _tail():                   # masked path: last real tile only
                out_ref[...] += _partial(True)
        # gt >= row_tiles (clamped duplicate tiles of a short last chunk):
        # neither branch fires -> no wasted compute, block stays as-is.


def _default_num_chunks():
    """2 on v7x (two TensorCores per chip), 1 on single-core v5e/v6e."""
    try:
        kind = jax.devices()[0].device_kind.lower()
    except Exception:
        return 1
    return 2 if "7" in kind else 1


def content_loss_forward(x, target, *, tile_rows=4096, num_chunks=None,
                         vmem_limit_bytes=32 * 1024 * 1024):
    """Pallas implementation of ContentLoss.forward.

    Returns (input_passthrough, loss_scalar).  The passthrough is the input
    unchanged; the scalar corresponds to the module's `self.loss` attribute.
    """
    assert x.shape == target.shape, "input and target must have identical shapes"
    total = x.size
    lanes = _LANES
    sub = 16 if x.dtype == jnp.bfloat16 else 8

    xf = x.reshape(-1)
    tf = target.reshape(-1)

    rows = total // lanes
    lane_rem = total - rows * lanes        # < 128 trailing elements

    if rows < sub:
        # Degenerate tiny input: not worth a kernel launch.
        diff = xf.astype(jnp.float32) - tf.astype(jnp.float32)
        return x, jnp.sum(diff * diff) / jnp.float32(total)

    tail_sum = jnp.float32(0.0)
    if lane_rem:
        # Rare: element count not a multiple of 128 lanes.  Handle the < 128
        # trailing elements with a tiny wrapper-side reduction instead of
        # padding/rewriting the full tensors.
        xt = jax.lax.slice(xf, (rows * lanes,), (total,)).astype(jnp.float32)
        tt = jax.lax.slice(tf, (rows * lanes,), (total,)).astype(jnp.float32)
        tail_sum = jnp.sum((xt - tt) ** 2)
        xf = jax.lax.slice(xf, (0,), (rows * lanes,))
        tf = jax.lax.slice(tf, (0,), (rows * lanes,))

    x2 = xf.reshape(rows, lanes)
    t2 = tf.reshape(rows, lanes)

    # --- Tile sizing -------------------------------------------------------
    # acc_rows: accumulator / output-block height (64 for ILP where possible).
    # tile_rows: streaming tile height, a multiple of acc_rows, never > rows.
    acc_rows = 64 if rows >= 64 else (rows // sub) * sub
    tile_rows = max(acc_rows,
                    min((tile_rows // acc_rows) * acc_rows,
                        (rows // acc_rows) * acc_rows))
    row_tiles = pl.cdiv(rows, tile_rows)

    if num_chunks is None:
        num_chunks = _default_num_chunks()
    num_chunks = max(1, min(num_chunks, row_tiles))
    tiles_per_chunk = pl.cdiv(row_tiles, num_chunks)

    need_row_mask = (rows % tile_rows) != 0
    need_clamp = num_chunks * tiles_per_chunk > row_tiles

    if need_clamp:
        def in_index_map(c, k):
            # Clamp so a short last chunk never DMAs out of bounds; the
            # re-read tile is skipped in-kernel.
            return (jnp.minimum(c * tiles_per_chunk + k, row_tiles - 1), 0)
    else:
        def in_index_map(c, k):
            return (c * tiles_per_chunk + k, 0)

    kernel = functools.partial(
        _mse_partial_kernel,
        rows=rows,
        tile_rows=tile_rows,
        tiles_per_chunk=tiles_per_chunk,
        row_tiles=row_tiles,
        acc_rows=acc_rows,
        need_row_mask=need_row_mask,
        need_clamp=need_clamp,
    )

    partials = pl.pallas_call(
        kernel,
        out_shape=jax.ShapeDtypeStruct((num_chunks * acc_rows, lanes),
                                       jnp.float32),
        grid_spec=pltpu.PrefetchScalarGridSpec(
            num_scalar_prefetch=0,
            grid=(num_chunks, tiles_per_chunk),
            in_specs=[
                pl.BlockSpec((tile_rows, lanes), in_index_map),
                pl.BlockSpec((tile_rows, lanes), in_index_map),
            ],
            out_specs=pl.BlockSpec((acc_rows, lanes), lambda c, k: (c, 0)),
        ),
        compiler_params=pltpu.CompilerParams(
            # Chunk axis sharded across TensorCores on v7x; row-tile axis is
            # the reduction.
            # TODO(synk): verify in xprof that both v7x cores stream disjoint
            # row ranges; switch to pltpu.CORE_PARALLEL if "parallel" alone
            # does not engage megacore sharding.
            dimension_semantics=("parallel", "arbitrary"),
            vmem_limit_bytes=vmem_limit_bytes,
        ),
    )(x2, t2)

    loss = (jnp.sum(partials) + tail_sum) / jnp.float32(total)
    # Module returns the input unchanged (identity passthrough).
    return x, loss


if __name__ == "__main__":
    key = jax.random.PRNGKey(0)
    k1, k2, k3, k4, k5, k6 = jax.random.split(key, 6)

    # --- Test 1: canonical small NCHW feature map, simple single-tile path.
    shape = (2, 4, 16, 16)
    x = jax.random.normal(k1, shape, dtype=jnp.float32)
    target = jax.random.normal(k2, shape, dtype=jnp.float32)  # "detached"
    out, loss = content_loss_forward(x, target)
    jax.block_until_ready((out, loss))
    ref = jnp.mean((x - target) ** 2)
    assert jnp.allclose(loss, ref, rtol=1e-5, atol=1e-6), (loss, ref)
    assert jnp.array_equal(out, x)  # passthrough must be exact

    # --- Test 2: multi-tile + chunked + clamped + row-tail-masked paths.
    shape2 = (1, 3, 56, 128)          # 21504 elems -> 168 rows of 128 lanes
    x2 = jax.random.normal(k3, shape2, dtype=jnp.float32)
    t2 = jax.random.normal(k4, shape2, dtype=jnp.float32)
    out2, loss2 = content_loss_forward(x2, t2, tile_rows=64, num_chunks=2)
    jax.block_until_ready((out2, loss2))
    ref2 = jnp.mean((x2 - t2) ** 2)
    assert jnp.allclose(loss2, ref2, rtol=1e-5, atol=1e-6), (loss2, ref2)
    assert jnp.array_equal(out2, x2)

    # --- Test 3: element count not a multiple of 128 -> wrapper lane-tail.
    shape3 = (2, 5, 13, 17)           # 2210 elems -> 17 rows + 34 tail elems
    x3 = jax.random.normal(k5, shape3, dtype=jnp.float32)
    t3 = jax.random.normal(k6, shape3, dtype=jnp.float32)
    out3, loss3 = content_loss_forward(x3, t3)
    jax.block_until_ready((out3, loss3))
    ref3 = jnp.mean((x3 - t3) ** 2)
    assert jnp.allclose(loss3, ref3, rtol=1e-5, atol=1e-6), (loss3, ref3)
    assert jnp.array_equal(out3, x3)

    print("KERNEL_OK")
</pallas_src>

<mosaic_0001>
module attributes {stable_mosaic.version = 11 : i64} {
  func.func @_mse_partial_kernel(%arg0: i32, %arg1: i32, %arg2: memref<16x128xf32, #tpu.memory_space<vmem>>, %arg3: memref<16x128xf32, #tpu.memory_space<vmem>>, %arg4: memref<16x128xf32, #tpu.memory_space<vmem>>) attributes {dimension_semantics = [#tpu.dimension_semantics<parallel>, #tpu.dimension_semantics<arbitrary>], iteration_bounds = array<i64: 1, 1>, scalar_prefetch = 0 : i64, scratch_operands = 0 : i64, tpu.core_type = #tpu.core_type<tc>, window_params = [{transform_indices = @transform_0, window_bounds = array<i64: 16, 128>}, {transform_indices = @transform_1, window_bounds = array<i64: 16, 128>}, {transform_indices = @transform_2, window_bounds = array<i64: 16, 128>}]} {
    %c0_i32 = arith.constant 0 : i32
    %0 = arith.cmpi eq, %arg1, %c0_i32 : i32
    %1 = arith.extui %0 : i1 to i32
    %c0_i32_0 = arith.constant 0 : i32
    %2 = arith.cmpi ne, %1, %c0_i32_0 : i32
    scf.if %2 {
      %cst = arith.constant 0.000000e+00 : f32
      %10 = vector.broadcast %cst : f32 to vector<16x128xf32>
      %c0_8 = arith.constant 0 : index
      %c0_9 = arith.constant 0 : index
      %11 = vector.load %arg4[%c0_8, %c0_9] : memref<16x128xf32, #tpu.memory_space<vmem>>, vector<16x128xf32>
      tpu.vector_store %arg4[%c0_8, %c0_9], %10 {strides = array<i32>} : memref<16x128xf32, #tpu.memory_space<vmem>>, vector<16x128xf32>,
    } else {
    }
    %c0 = arith.constant 0 : index
    %c0_1 = arith.constant 0 : index
    %3 = vector.load %arg4[%c0, %c0_1] : memref<16x128xf32, #tpu.memory_space<vmem>>, vector<16x128xf32>
    %c0_2 = arith.constant 0 : index
    %c0_3 = arith.constant 0 : index
    %4 = vector.load %arg2[%c0_2, %c0_3] : memref<16x128xf32, #tpu.memory_space<vmem>>, vector<16x128xf32>
    %c0_4 = arith.constant 0 : index
    %c0_5 = arith.constant 0 : index
    %5 = vector.load %arg3[%c0_4, %c0_5] : memref<16x128xf32, #tpu.memory_space<vmem>>, vector<16x128xf32>
    %6 = arith.subf %4, %5 : vector<16x128xf32>
    %7 = arith.mulf %6, %6 : vector<16x128xf32>
    %8 = arith.addf %3, %7 : vector<16x128xf32>
    %c0_6 = arith.constant 0 : index
    %c0_7 = arith.constant 0 : index
    %9 = vector.load %arg4[%c0_6, %c0_7] : memref<16x128xf32, #tpu.memory_space<vmem>>, vector<16x128xf32>
    tpu.vector_store %arg4[%c0_6, %c0_7], %8 {strides = array<i32>} : memref<16x128xf32, #tpu.memory_space<vmem>>, vector<16x128xf32>,
    return
  }
  func.func @transform_0(%arg0: i32, %arg1: i32) -> (i32, i32) {
    %c1_i32 = arith.constant 1 : i32
    %0 = arith.muli %arg0, %c1_i32 : i32
    %1 = arith.addi %0, %arg1 : i32
    %c0_i32 = arith.constant 0 : i32
    %c0_i32_0 = arith.constant 0 : i32
    return %1, %c0_i32 : i32, i32
  }
  func.func @transform_1(%arg0: i32, %arg1: i32) -> (i32, i32) {
    %c1_i32 = arith.constant 1 : i32
    %0 = arith.muli %arg0, %c1_i32 : i32
    %1 = arith.addi %0, %arg1 : i32
    %c0_i32 = arith.constant 0 : i32
    %c0_i32_0 = arith.constant 0 : i32
    return %1, %c0_i32 : i32, i32
  }
  func.func @transform_2(%arg0: i32, %arg1: i32) -> (i32, i32) {
    %c0_i32 = arith.constant 0 : i32
    %c0_i32_0 = arith.constant 0 : i32
    return %arg0, %c0_i32 : i32, i32
  }
}

</mosaic_0001>

<bundles_post_ra>
// kernel: tpu_custom_call.1
= control target key start
LH: loop header
LB: loop body
LE: loop exit
PB: predicated region body
PF: predicated region fallthrough
CT: control target
= control target key end

     0   :  { %7 = vsyncpa [#allocation3], 0  ;;  %s200_s0 = inlined_call_operand.hbm [shape: f32[16,128], index: 0, kind: input, shape index: {}]   ;;  %s201_s1 = inlined_call_operand.hbm [shape: f32[16,128], index: 1, kind: input, shape index: {}]   ;;  %s202_s2 = inlined_call_operand.hbm [shape: f32[16,128], index: 2, kind: output, shape index: {}]  }
   0x1   :  { %8 = vsyncpa [#allocation6], 0 }
   0x2   :  { %9 = vsyncpa [#allocation4], 0  ;;  %s162_s9 = smov [#allocation2]  }
   0x3   :  { %s19_s10 = sshll.u32 %s162_s9, 4  ;;  %s20_s10 = int_to_ptr.vmem [resolvable:$true] %s19_s10 }
   0x4   :  { %s104_s11 = scalar_lea.vmem %s20_s10, 256  ;;  %p109_p1 = scmp.lt.s32.totalorder %s20_s10, %s20_s10 }
   0x5   :  { %p105_p0 = scmp.ne.s32.totalorder %s20_s10, %s104_s11  ;;  %p110_p2 = scmp.lt.s32.totalorder %s104_s11, %s104_s11 }
   0x7   :  { %p111_p3 = por %p110_p2, %p109_p1 }
   0x9   :  { %p112_p4 = pnand %p111_p3, %p105_p0 }
   0xb   :  { %115 = shalt.err (!%p112_p4)
}
   0xc   :  { %s163_s12 = smov 128   ;;  %s164_s13 = smov 8  }
   0xd   :  { %25 = dma.hbm_to_vmem [thread:$0]  %s200_s0, 256, %s20_s10, [#allocation3], %s163_s12, %s163_s12, %s164_s13  }
   0xe   :  { %s165_s16 = smov [#allocation5]  }
   0xf   :  { %s35_s17 = sshll.u32 %s165_s16, 4  ;;  %s36_s17 = int_to_ptr.vmem [resolvable:$true] %s35_s17 }
  0x10   :  { %s124_s18 = scalar_lea.vmem %s36_s17, 256  ;;  %p129_p6 = scmp.lt.s32.totalorder %s36_s17, %s36_s17 }
  0x11   :  { %p125_p5 = scmp.ne.s32.totalorder %s36_s17, %s124_s18  ;;  %p130_p7 = scmp.lt.s32.totalorder %s124_s18, %s124_s18 }
  0x13   :  { %p131_p8 = por %p130_p7, %p129_p6 }
  0x15   :  { %p132_p9 = pnand %p131_p8, %p125_p5 }
  0x17   :  { %135 = shalt.err (!%p132_p9)
}
  0x18   :  { %41 = dma.hbm_to_vmem [thread:$0]  %s201_s1, 256, %s36_s17, [#allocation6], %s163_s12, %s163_s12, %s164_s13  }
  0x19   :  { %156 = dma.done.wait [#allocation3], 256  }
  0x1a   :  { %157 = vsyncadd [#allocation3], 4294967040 }
  0x1b   :  { %158 = dma.done.wait [#allocation6], 256  }
  0x1c   :  { %159 = vsyncadd [#allocation6], 4294967040  ;;  %v60_v0 = vld [vmem:[#allocation2] sm:$0xff]  ;;  %v62_v1 = vld [vmem:[#allocation5] sm:$0xff]  ;;  %s166_s0 = smov [#allocation7]  }
  0x1d   :  { %v61_v2 = vld [vmem:[#allocation2 + $0x8] sm:$0xff]  ;;  %v64_v3 = vsub.f32 %v60_v0, %v62_v1  ;;  %v63_v4 = vld [vmem:[#allocation5 + $0x8] sm:$0xff]  ;;  %s77_s21 = sshll.u32 %s166_s0, 4  ;;  %s78_s21 = int_to_ptr.vmem [resolvable:$true] %s77_s21 }
  0x1e   :  { %v65_v5 = vsub.f32 %v61_v2, %v63_v4  ;;  %s136_s22 = scalar_lea.vmem %s78_s21, 256  ;;  %p141_p11 = scmp.lt.s32.totalorder %s78_s21, %s78_s21 }
  0x1f   :  { %v66_v6 = vmul.f32 %v64_v3, %v64_v3  ;;  %p137_p10 = scmp.ne.s32.totalorder %s78_s21, %s136_s22  ;;  %p142_p12 = scmp.lt.s32.totalorder %s136_s22, %s136_s22 }
  0x20   :  { %v67_v7 = vmul.f32 %v65_v5, %v65_v5 }
  0x21   :  { %70 = vst [vmem:[#allocation7] sm:$0xff] %v66_v6  ;;  %p143_p13 = por %p142_p12, %p141_p11 }
  0x22   :  { %71 = vst [vmem:[#allocation7 + $0x8] sm:$0xff] %v67_v7 }
  0x23   :  { %p144_p0 = pnand %p143_p13, %p137_p10 }
  0x25   :  { %147 = shalt.err (!%p144_p0)
}
  0x26   :  { %83 = dma.vmem_to_hbm [thread:$0]  %s78_s21, 256, %s202_s2, [#allocation4], %s163_s12, %s163_s12, %s164_s13  }
  0x27   :  { %160 = dma.done.wait [#allocation4], 256  }
  0x28   :  { %161 = vsyncadd [#allocation4], 4294967040 }
  0x29   :  { %87 = vsyncpa [#allocation3], 1 }
  0x2a   :  { %88 = vsyncpa [#allocation6], 1 }
  0x2b   :  { %89 = vsyncpa [#allocation4], 1 }

</bundles_post_ra>
